<compile_context>
chip_gen: v7x
topology: tpu7x:2x2x1
jax: 0.10.0
libtpu: 0.0.40
codegen_flags: <defaults>
</compile_context>

<pallas_src>
import functools

import jax
import jax.numpy as jnp
from jax.experimental import pallas as pl
from jax.experimental.pallas import tpu as pltpu

LN_EPS = 1e-5
LANE = 128


def _round_up(x, m):
    return ((x + m - 1) // m) * m


def _pad2d(x, rows, cols):
    return jnp.pad(x, ((0, rows - x.shape[0]), (0, cols - x.shape[1])))


# ---------------------------------------------------------------------------
# Kernel (single grid step per batch tile; everything else is resident)
# ---------------------------------------------------------------------------
def qfunction_kernel(obs_ref, act_ref,
                     wt_ref, bt_ref, g_ref, beta_ref,
                     w1_ref, b1_ref, w2_ref, b2_ref,
                     out_ref, *, feature_dim, inv_f):
    # ---- Trunk: Linear(repr_dim -> feature_dim) on the MXU -----------------
    # obs arrives f32; cast to bf16 right before the dot (f32 accumulation).
    x = jnp.dot(obs_ref[...].astype(jnp.bfloat16), wt_ref[...],
                preferred_element_type=jnp.float32) + bt_ref[...]  # (TB, F_pad)

    # ---- LayerNorm (two-pass, lane-masked stats) + Tanh ---------------------
    # Padded feature lanes of x are exactly zero (zero-padded wt/bt), so the
    # plain lane sum / real feature count gives the exact mean.
    lane = jax.lax.broadcasted_iota(jnp.int32, x.shape, 1)
    valid = lane < feature_dim
    mu = jnp.sum(x, axis=-1, keepdims=True) * inv_f
    d = jnp.where(valid, x - mu, 0.0)
    var = jnp.sum(d * d, axis=-1, keepdims=True) * inv_f
    x = jnp.tanh(d * jax.lax.rsqrt(var + LN_EPS) * g_ref[...] + beta_ref[...])
    # pad lanes of x are now exactly 0 (gamma/beta zero-padded).

    # ---- q head: concat -> Linear -> ReLU -> Linear -------------------------
    # Action is pre-packed into lanes [feature_dim, feature_dim+action_dim) of
    # act_ref (zeros elsewhere), so a single add realizes the concat and a
    # single fused W1 matmul replaces the obs/act pair of matmuls.
    cat = x + act_ref[...]
    h = jnp.dot(cat.astype(jnp.bfloat16), w1_ref[...],
                preferred_element_type=jnp.float32) + b1_ref[...]   # (TB, H_pad)
    h = jnp.maximum(h, 0.0)

    # Final (H -> 1) projection as VPU multiply + lane reduction; write a
    # lane-dense 128-wide output slab (unmasked vst).
    q = jnp.sum(h * w2_ref[...], axis=-1, keepdims=True) + b2_ref[...]
    out_ref[...] = jnp.broadcast_to(q, out_ref.shape)


# ---------------------------------------------------------------------------
# Parameter preparation (pad + cast ONCE, hoisted out of the forward call)
# ---------------------------------------------------------------------------
def prepare_params(params, repr_dim, action_dim):
    feature_dim = params["wt"].shape[1]
    hidden_dim = params["w1_obs"].shape[1]
    cat_dim = feature_dim + action_dim

    k_pad = _round_up(repr_dim, LANE)                 # independent of any tile
    f_pad = _round_up(max(feature_dim, cat_dim), LANE)
    h_pad = _round_up(hidden_dim, LANE)

    wt = _pad2d(params["wt"], k_pad, f_pad).astype(jnp.bfloat16)
    bt = _pad2d(params["bt"], 1, f_pad)
    g = _pad2d(params["ln_g"], 1, f_pad)
    beta = _pad2d(params["ln_b"], 1, f_pad)

    # Fused W1: rows [0, feature_dim) <- w1_obs, rows [feature_dim, cat_dim) <- w1_act.
    w1 = jnp.zeros((f_pad, h_pad), jnp.float32)
    w1 = w1.at[:feature_dim, :hidden_dim].set(params["w1_obs"])
    w1 = w1.at[feature_dim:cat_dim, :hidden_dim].set(params["w1_act"])
    w1 = w1.astype(jnp.bfloat16)

    b1 = _pad2d(params["b1"], 1, h_pad)
    w2 = _pad2d(params["w2"].reshape(1, -1), 1, h_pad)      # (1, H_pad) f32
    b2 = params["b2"].reshape(1, 1).astype(jnp.float32)

    meta = dict(repr_dim=repr_dim, action_dim=action_dim,
                feature_dim=feature_dim, hidden_dim=hidden_dim,
                k_pad=k_pad, f_pad=f_pad, h_pad=h_pad)
    return dict(wt=wt, bt=bt, g=g, beta=beta, w1=w1, b1=b1, w2=w2, b2=b2,
                meta=meta)


def _pick_batch_tile(B, k_pad, f_pad, h_pad, vmem_limit_bytes):
    # Small batches: one small tile (16-row granule keeps bf16 packing legal).
    if B <= 128:
        tb = max(16, _round_up(B, 16))
    elif B < 512:
        tb = 128
    else:
        tb = 256          # fill MXU rows on v6e/v7x; still >= 2 batch tiles
    # Shrink tb if the f32 obs stream (double-buffered) would blow VMEM.
    def est(t):
        streamed = 2 * (t * k_pad * 4 + t * f_pad * 4 + t * LANE * 4)
        resident = 2 * (k_pad * f_pad * 2 + f_pad * h_pad * 2
                        + 4 * f_pad * 4 + 2 * h_pad * 4)
        return streamed + resident
    while tb > 16 and est(tb) > int(0.8 * vmem_limit_bytes):
        tb //= 2
    return max(tb, 16)


# ---------------------------------------------------------------------------
# Forward wrapper
# ---------------------------------------------------------------------------
def qfunction_forward(obs, action, prepared, *, tb=None,
                      vmem_limit_bytes=32 * 1024 * 1024):
    B, repr_dim = obs.shape
    action_dim = action.shape[1]
    meta = prepared["meta"]
    assert repr_dim == meta["repr_dim"] and action_dim == meta["action_dim"]
    feature_dim = meta["feature_dim"]
    k_pad, f_pad, h_pad = meta["k_pad"], meta["f_pad"], meta["h_pad"]

    if tb is None:
        tb = _pick_batch_tile(B, k_pad, f_pad, h_pad, vmem_limit_bytes)
    b_pad = _round_up(B, tb)
    n_b = b_pad // tb

    # obs stays f32 (bf16 cast happens in-kernel); action is zero-packed into
    # the concat lanes [feature_dim, feature_dim+action_dim) of an f_pad tile.
    obs_p = jnp.pad(obs, ((0, b_pad - B), (0, k_pad - repr_dim)))
    act_p = jnp.pad(action, ((0, b_pad - B),
                             (feature_dim, f_pad - feature_dim - action_dim)))

    const = lambda i: (0, 0)
    in_specs = [
        pl.BlockSpec((tb, k_pad), lambda i: (i, 0)),       # obs (streams, f32)
        pl.BlockSpec((tb, f_pad), lambda i: (i, 0)),       # packed action
        pl.BlockSpec((k_pad, f_pad), const),               # trunk weight (bf16)
        pl.BlockSpec((1, f_pad), const),                   # trunk bias
        pl.BlockSpec((1, f_pad), const),                   # LN gamma
        pl.BlockSpec((1, f_pad), const),                   # LN beta
        pl.BlockSpec((f_pad, h_pad), const),               # fused W1 (bf16)
        pl.BlockSpec((1, h_pad), const),                   # b1
        pl.BlockSpec((1, h_pad), const),                   # w2 row
        pl.BlockSpec((1, 1), const),                       # b2
    ]
    out_specs = pl.BlockSpec((tb, LANE), lambda i: (i, 0))

    flops = (2 * b_pad * k_pad * f_pad
             + 2 * b_pad * f_pad * h_pad
             + 2 * b_pad * h_pad)
    bytes_accessed = (b_pad * k_pad * 4 + b_pad * f_pad * 4
                      + k_pad * f_pad * 2 + f_pad * h_pad * 2
                      + 4 * f_pad * 4 + 2 * h_pad * 4
                      + b_pad * LANE * 4)
    cost = pl.CostEstimate(flops=int(flops),
                           transcendentals=int(b_pad * (f_pad + 1)),
                           bytes_accessed=int(bytes_accessed))

    kernel = functools.partial(qfunction_kernel,
                               feature_dim=feature_dim,
                               inv_f=1.0 / feature_dim)

    out = pl.pallas_call(
        kernel,
        out_shape=jax.ShapeDtypeStruct((b_pad, LANE), jnp.float32),
        grid_spec=pltpu.PrefetchScalarGridSpec(
            num_scalar_prefetch=0,
            grid=(n_b,),
            in_specs=in_specs,
            out_specs=out_specs,
        ),
        compiler_params=pltpu.CompilerParams(
            dimension_semantics=("parallel",),
            vmem_limit_bytes=vmem_limit_bytes,
        ),
        cost_estimate=cost,
    )(obs_p, act_p,
      prepared["wt"], prepared["bt"], prepared["g"], prepared["beta"],
      prepared["w1"], prepared["b1"], prepared["w2"], prepared["b2"])

    return out[:B, :1]


# ---------------------------------------------------------------------------
# Params / references
# ---------------------------------------------------------------------------
def init_params(key, repr_dim, action_dim, feature_dim, hidden_dim):
    ks = jax.random.split(key, 6)

    def lin(k, fan_in, fan_out):
        return jax.random.normal(k, (fan_in, fan_out), jnp.float32) / jnp.sqrt(fan_in)

    wt = lin(ks[0], repr_dim, feature_dim)
    bt = jax.random.normal(ks[1], (1, feature_dim), jnp.float32) * 0.01
    ln_g = jnp.ones((1, feature_dim), jnp.float32)
    ln_b = jnp.zeros((1, feature_dim), jnp.float32)

    w1_full = lin(ks[2], feature_dim + action_dim, hidden_dim)
    w1_obs = w1_full[:feature_dim]
    w1_act = w1_full[feature_dim:]
    b1 = jax.random.normal(ks[3], (1, hidden_dim), jnp.float32) * 0.01

    w2 = lin(ks[4], hidden_dim, 1)
    b2 = jax.random.normal(ks[5], (1, 1), jnp.float32) * 0.01

    return dict(wt=wt, bt=bt, ln_g=ln_g, ln_b=ln_b,
                w1_obs=w1_obs, w1_act=w1_act, b1=b1, w2=w2, b2=b2)


def qfunction_reference(obs, action, params):
    """Pure-JAX f32 reference matching the PyTorch forward (explicit concat)."""
    x = obs @ params["wt"] + params["bt"]
    mu = jnp.mean(x, axis=-1, keepdims=True)
    var = jnp.mean((x - mu) ** 2, axis=-1, keepdims=True)
    x = (x - mu) / jnp.sqrt(var + LN_EPS)
    x = jnp.tanh(x * params["ln_g"] + params["ln_b"])
    h = jnp.concatenate([x, action], axis=-1)
    w1 = jnp.concatenate([params["w1_obs"], params["w1_act"]], axis=0)
    h = jnp.maximum(h @ w1 + params["b1"], 0.0)
    return h @ params["w2"] + params["b2"]


def qfunction_reference_bf16(obs, action, params):
    """Reference with bf16 MXU inputs / f32 accumulation (matches kernel dtypes)."""
    bf = jnp.bfloat16
    x = jnp.dot(obs.astype(bf), params["wt"].astype(bf),
                preferred_element_type=jnp.float32) + params["bt"]
    mu = jnp.mean(x, axis=-1, keepdims=True)
    var = jnp.mean((x - mu) ** 2, axis=-1, keepdims=True)
    x = (x - mu) * jax.lax.rsqrt(var + LN_EPS)
    x = jnp.tanh(x * params["ln_g"] + params["ln_b"])
    h = (jnp.dot(x.astype(bf), params["w1_obs"].astype(bf),
                 preferred_element_type=jnp.float32)
         + jnp.dot(action.astype(bf), params["w1_act"].astype(bf),
                   preferred_element_type=jnp.float32)
         + params["b1"])
    h = jnp.maximum(h, 0.0)
    return h @ params["w2"] + params["b2"]


if __name__ == "__main__":
    B, REPR_DIM, ACT_DIM, FEATURE_DIM, HIDDEN_DIM = 8, 300, 6, 50, 64

    key = jax.random.PRNGKey(0)
    k_obs, k_act, k_par = jax.random.split(key, 3)

    obs = jax.random.normal(k_obs, (B, REPR_DIM), jnp.float32)
    action = jax.random.uniform(k_act, (B, ACT_DIM), jnp.float32, -1.0, 1.0)
    params = init_params(k_par, REPR_DIM, ACT_DIM, FEATURE_DIM, HIDDEN_DIM)

    # Pad / cast the parameters once (hoisted out of the forward call).
    prepared = prepare_params(params, REPR_DIM, ACT_DIM)

    q = qfunction_forward(obs, action, prepared)
    q = jax.block_until_ready(q)

    q_bf16 = qfunction_reference_bf16(obs, action, params)
    q_f32 = qfunction_reference(obs, action, params)

    assert q.shape == (B, 1)
    assert jnp.allclose(q, q_bf16, atol=5e-3, rtol=5e-3), "mismatch vs bf16 reference"
    assert jnp.allclose(q, q_f32, atol=5e-2, rtol=5e-2), "mismatch vs f32 reference"

    print("KERNEL_OK")
</pallas_src>

<mosaic_0001>
module attributes {stable_mosaic.version = 11 : i64} {
  func.func @qfunction_kernel(%arg0: i32, %arg1: memref<16x384xf32, #tpu.memory_space<vmem>>, %arg2: memref<16x128xf32, #tpu.memory_space<vmem>>, %arg3: memref<384x128xbf16, #tpu.memory_space<vmem>>, %arg4: memref<1x128xf32, #tpu.memory_space<vmem>>, %arg5: memref<1x128xf32, #tpu.memory_space<vmem>>, %arg6: memref<1x128xf32, #tpu.memory_space<vmem>>, %arg7: memref<128x128xbf16, #tpu.memory_space<vmem>>, %arg8: memref<1x128xf32, #tpu.memory_space<vmem>>, %arg9: memref<1x128xf32, #tpu.memory_space<vmem>>, %arg10: memref<1x1xf32, #tpu.memory_space<vmem>>, %arg11: memref<16x128xf32, #tpu.memory_space<vmem>>) attributes {dimension_semantics = [#tpu.dimension_semantics<parallel>], iteration_bounds = array<i64: 1>, scalar_prefetch = 0 : i64, scratch_operands = 0 : i64, tpu.core_type = #tpu.core_type<tc>, window_params = [{transform_indices = @transform_0, window_bounds = array<i64: 16, 384>}, {transform_indices = @transform_1, window_bounds = array<i64: 16, 128>}, {pipeline_mode = #tpu.pipeline_mode<synchronous>, transform_indices = @transform_2, window_bounds = array<i64: 384, 128>}, {pipeline_mode = #tpu.pipeline_mode<synchronous>, transform_indices = @transform_3, window_bounds = array<i64: 1, 128>}, {pipeline_mode = #tpu.pipeline_mode<synchronous>, transform_indices = @transform_4, window_bounds = array<i64: 1, 128>}, {pipeline_mode = #tpu.pipeline_mode<synchronous>, transform_indices = @transform_5, window_bounds = array<i64: 1, 128>}, {pipeline_mode = #tpu.pipeline_mode<synchronous>, transform_indices = @transform_6, window_bounds = array<i64: 128, 128>}, {pipeline_mode = #tpu.pipeline_mode<synchronous>, transform_indices = @transform_7, window_bounds = array<i64: 1, 128>}, {pipeline_mode = #tpu.pipeline_mode<synchronous>, transform_indices = @transform_8, window_bounds = array<i64: 1, 128>}, {pipeline_mode = #tpu.pipeline_mode<synchronous>, transform_indices = @transform_9, window_bounds = array<i64: 1, 1>}, {transform_indices = @transform_10, window_bounds = array<i64: 16, 128>}]} {
    %c0 = arith.constant 0 : index
    %c0_0 = arith.constant 0 : index
    %0 = vector.load %arg1[%c0, %c0_0] : memref<16x384xf32, #tpu.memory_space<vmem>>, vector<16x384xf32>
    %1 = arith.truncf %0 : vector<16x384xf32> to vector<16x384xbf16>
    %c0_1 = arith.constant 0 : index
    %c0_2 = arith.constant 0 : index
    %2 = vector.load %arg3[%c0_1, %c0_2] : memref<384x128xbf16, #tpu.memory_space<vmem>>, vector<384x128xbf16>
    %cst = arith.constant dense<0.000000e+00> : vector<16x128xf32>
    %3 = tpu.matmul %1, %2, %cst {dimension_numbers = #tpu.dot_dimension_numbers<[1], [0], [0], [1], [0, 0, 1, 1], [], []>} : vector<16x384xbf16>, vector<384x128xbf16>, vector<16x128xf32> -> vector<16x128xf32>
    %c0_3 = arith.constant 0 : index
    %c0_4 = arith.constant 0 : index
    %4 = vector.load %arg4[%c0_3, %c0_4] : memref<1x128xf32, #tpu.memory_space<vmem>>, vector<1x128xf32>
    %5 = vector.broadcast %4 : vector<1x128xf32> to vector<16x128xf32>
    %6 = arith.addf %3, %5 : vector<16x128xf32>
    %7 = tpu.iota {dimensions = array<i32: 1>} : vector<16x128xi32>
    %c50_i32 = arith.constant 50 : i32
    %8 = vector.broadcast %c50_i32 : i32 to vector<16x128xi32>
    %9 = arith.cmpi slt, %7, %8 : vector<16x128xi32>
    %cst_5 = arith.constant dense<0.000000e+00> : vector<16xf32>
    %10 = vector.multi_reduction <add>, %6, %cst_5 [1] : vector<16x128xf32> to vector<16xf32>
    %11 = vector.shape_cast %10 : vector<16xf32> to vector<16x1xf32>
    %cst_6 = arith.constant 2.000000e-02 : f32
    %12 = vector.broadcast %cst_6 : f32 to vector<16x1xf32>
    %13 = arith.mulf %11, %12 : vector<16x1xf32>
    %14 = vector.broadcast %13 : vector<16x1xf32> to vector<16x128xf32>
    %15 = arith.subf %6, %14 : vector<16x128xf32>
    %cst_7 = arith.constant 0.000000e+00 : f32
    %16 = vector.broadcast %cst_7 : f32 to vector<16x128xf32>
    %17 = arith.select %9, %15, %16 : vector<16x128xi1>, vector<16x128xf32>
    %18 = arith.mulf %17, %17 : vector<16x128xf32>
    %cst_8 = arith.constant dense<0.000000e+00> : vector<16xf32>
    %19 = vector.multi_reduction <add>, %18, %cst_8 [1] : vector<16x128xf32> to vector<16xf32>
    %20 = vector.shape_cast %19 : vector<16xf32> to vector<16x1xf32>
    %cst_9 = arith.constant 2.000000e-02 : f32
    %21 = vector.broadcast %cst_9 : f32 to vector<16x1xf32>
    %22 = arith.mulf %20, %21 : vector<16x1xf32>
    %cst_10 = arith.constant 9.99999974E-6 : f32
    %23 = vector.broadcast %cst_10 : f32 to vector<16x1xf32>
    %24 = arith.addf %22, %23 : vector<16x1xf32>
    %25 = math.rsqrt %24 : vector<16x1xf32>
    %26 = vector.broadcast %25 : vector<16x1xf32> to vector<16x128xf32>
    %27 = arith.mulf %17, %26 : vector<16x128xf32>
    %c0_11 = arith.constant 0 : index
    %c0_12 = arith.constant 0 : index
    %28 = vector.load %arg5[%c0_11, %c0_12] : memref<1x128xf32, #tpu.memory_space<vmem>>, vector<1x128xf32>
    %29 = vector.broadcast %28 : vector<1x128xf32> to vector<16x128xf32>
    %30 = arith.mulf %27, %29 : vector<16x128xf32>
    %c0_13 = arith.constant 0 : index
    %c0_14 = arith.constant 0 : index
    %31 = vector.load %arg6[%c0_13, %c0_14] : memref<1x128xf32, #tpu.memory_space<vmem>>, vector<1x128xf32>
    %32 = vector.broadcast %31 : vector<1x128xf32> to vector<16x128xf32>
    %33 = arith.addf %30, %32 : vector<16x128xf32>
    %34 = math.tanh %33 : vector<16x128xf32>
    %c0_15 = arith.constant 0 : index
    %c0_16 = arith.constant 0 : index
    %35 = vector.load %arg2[%c0_15, %c0_16] : memref<16x128xf32, #tpu.memory_space<vmem>>, vector<16x128xf32>
    %36 = arith.addf %34, %35 : vector<16x128xf32>
    %37 = arith.truncf %36 : vector<16x128xf32> to vector<16x128xbf16>
    %c0_17 = arith.constant 0 : index
    %c0_18 = arith.constant 0 : index
    %38 = vector.load %arg7[%c0_17, %c0_18] : memref<128x128xbf16, #tpu.memory_space<vmem>>, vector<128x128xbf16>
    %cst_19 = arith.constant dense<0.000000e+00> : vector<16x128xf32>
    %39 = tpu.matmul %37, %38, %cst_19 {dimension_numbers = #tpu.dot_dimension_numbers<[1], [0], [0], [1], [0, 0, 1, 1], [], []>} : vector<16x128xbf16>, vector<128x128xbf16>, vector<16x128xf32> -> vector<16x128xf32>
    %c0_20 = arith.constant 0 : index
    %c0_21 = arith.constant 0 : index
    %40 = vector.load %arg8[%c0_20, %c0_21] : memref<1x128xf32, #tpu.memory_space<vmem>>, vector<1x128xf32>
    %41 = vector.broadcast %40 : vector<1x128xf32> to vector<16x128xf32>
    %42 = arith.addf %39, %41 : vector<16x128xf32>
    %cst_22 = arith.constant 0.000000e+00 : f32
    %43 = vector.broadcast %cst_22 : f32 to vector<16x128xf32>
    %44 = arith.maximumf %42, %43 : vector<16x128xf32>
    %c0_23 = arith.constant 0 : index
    %c0_24 = arith.constant 0 : index
    %45 = vector.load %arg9[%c0_23, %c0_24] : memref<1x128xf32, #tpu.memory_space<vmem>>, vector<1x128xf32>
    %46 = vector.broadcast %45 : vector<1x128xf32> to vector<16x128xf32>
    %47 = arith.mulf %44, %46 : vector<16x128xf32>
    %cst_25 = arith.constant dense<0.000000e+00> : vector<16xf32>
    %48 = vector.multi_reduction <add>, %47, %cst_25 [1] : vector<16x128xf32> to vector<16xf32>
    %49 = vector.shape_cast %48 : vector<16xf32> to vector<16x1xf32>
    %c0_26 = arith.constant 0 : index
    %c0_27 = arith.constant 0 : index
    %50 = vector.load %arg10[%c0_26, %c0_27] : memref<1x1xf32, #tpu.memory_space<vmem>>, vector<1x1xf32>
    %51 = vector.broadcast %50 : vector<1x1xf32> to vector<16x1xf32>
    %52 = arith.addf %49, %51 : vector<16x1xf32>
    %53 = vector.shape_cast %52 : vector<16x1xf32> to vector<16x1xf32>
    %54 = vector.broadcast %53 : vector<16x1xf32> to vector<16x128xf32>
    %c0_28 = arith.constant 0 : index
    %c0_29 = arith.constant 0 : index
    %55 = vector.load %arg11[%c0_28, %c0_29] : memref<16x128xf32, #tpu.memory_space<vmem>>, vector<16x128xf32>
    tpu.vector_store %arg11[%c0_28, %c0_29], %54 {strides = array<i32>} : memref<16x128xf32, #tpu.memory_space<vmem>>, vector<16x128xf32>,
    return
  }
  func.func @transform_0(%arg0: i32) -> (i32, i32) {
    %c0_i32 = arith.constant 0 : i32
    %c0_i32_0 = arith.constant 0 : i32
    return %arg0, %c0_i32 : i32, i32
  }
  func.func @transform_1(%arg0: i32) -> (i32, i32) {
    %c0_i32 = arith.constant 0 : i32
    %c0_i32_0 = arith.constant 0 : i32
    return %arg0, %c0_i32 : i32, i32
  }
  func.func @transform_2(%arg0: i32) -> (i32, i32) {
    %c0_i32 = arith.constant 0 : i32
    %c0_i32_0 = arith.constant 0 : i32
    %c0_i32_1 = arith.constant 0 : i32
    return %c0_i32, %c0_i32_0 : i32, i32
  }
  func.func @transform_3(%arg0: i32) -> (i32, i32) {
    %c0_i32 = arith.constant 0 : i32
    %c0_i32_0 = arith.constant 0 : i32
    %c0_i32_1 = arith.constant 0 : i32
    return %c0_i32, %c0_i32_0 : i32, i32
  }
  func.func @transform_4(%arg0: i32) -> (i32, i32) {
    %c0_i32 = arith.constant 0 : i32
    %c0_i32_0 = arith.constant 0 : i32
    %c0_i32_1 = arith.constant 0 : i32
    return %c0_i32, %c0_i32_0 : i32, i32
  }
  func.func @transform_5(%arg0: i32) -> (i32, i32) {
    %c0_i32 = arith.constant 0 : i32
    %c0_i32_0 = arith.constant 0 : i32
    %c0_i32_1 = arith.constant 0 : i32
    return %c0_i32, %c0_i32_0 : i32, i32
  }
  func.func @transform_6(%arg0: i32) -> (i32, i32) {
    %c0_i32 = arith.constant 0 : i32
    %c0_i32_0 = arith.constant 0 : i32
    %c0_i32_1 = arith.constant 0 : i32
    return %c0_i32, %c0_i32_0 : i32, i32
  }
  func.func @transform_7(%arg0: i32) -> (i32, i32) {
    %c0_i32 = arith.constant 0 : i32
    %c0_i32_0 = arith.constant 0 : i32
    %c0_i32_1 = arith.constant 0 : i32
    return %c0_i32, %c0_i32_0 : i32, i32
  }
  func.func @transform_8(%arg0: i32) -> (i32, i32) {
    %c0_i32 = arith.constant 0 : i32
    %c0_i32_0 = arith.constant 0 : i32
    %c0_i32_1 = arith.constant 0 : i32
    return %c0_i32, %c0_i32_0 : i32, i32
  }
  func.func @transform_9(%arg0: i32) -> (i32, i32) {
    %c0_i32 = arith.constant 0 : i32
    %c0_i32_0 = arith.constant 0 : i32
    %c0_i32_1 = arith.constant 0 : i32
    return %c0_i32, %c0_i32_0 : i32, i32
  }
  func.func @transform_10(%arg0: i32) -> (i32, i32) {
    %c0_i32 = arith.constant 0 : i32
    %c0_i32_0 = arith.constant 0 : i32
    return %arg0, %c0_i32 : i32, i32
  }
}

</mosaic_0001>

<bundles_post_ra>
// kernel: tpu_custom_call.1
= control target key start
LH: loop header
LB: loop body
LE: loop exit
PB: predicated region body
PF: predicated region fallthrough
CT: control target
= control target key end

     0   :  { %s1068_s0 = inlined_call_operand.hbm [shape: f32[16,384], index: 0, kind: input, shape index: {}]   ;;  %s1069_s1 = inlined_call_operand.hbm [shape: f32[16,128], index: 1, kind: input, shape index: {}]   ;;  %s1070_s2 = inlined_call_operand.hbm [shape: bf16[384,128], index: 2, kind: input, shape index: {}]   ;;  %s1071_s3 = inlined_call_operand.vmem [shape: f32[1,128], index: 3, kind: input, shape index: {}]   ;;  %s1072_s4 = inlined_call_operand.vmem [shape: f32[1,128], index: 4, kind: input, shape index: {}]   ;;  %s1073_s5 = inlined_call_operand.vmem [shape: f32[1,128], index: 5, kind: input, shape index: {}]   ;;  %s1074_s6 = inlined_call_operand.hbm [shape: bf16[128,128], index: 6, kind: input, shape index: {}]   ;;  %s1075_s7 = inlined_call_operand.vmem [shape: f32[1,128], index: 7, kind: input, shape index: {}]   ;;  %s1076_s8 = inlined_call_operand.vmem [shape: f32[1,128], index: 8, kind: input, shape index: {}]   ;;  %s1077_s9 = inlined_call_operand.<no memory space> [shape: f32[1,1], index: 9, kind: input, shape index: {}]   ;;  %s1078_s10 = inlined_call_operand.hbm [shape: f32[16,128], index: 10, kind: output, shape index: {}]  }
   0x1   :  { %v15_v0 = vstv %s1077_s9 }
   0x2   :  { %16 = vst [vmem:[#allocation2] sm:$0x1] %v15_v0 }
   0x3   :  { %17 = vsyncpa [#allocation4], 0 }
   0x4   :  { %18 = vsyncpa [#allocation7], 0 }
   0x5   :  { %19 = vsyncpa [#allocation10], 0 }
   0x6   :  { %20 = vsyncpa [#allocation5], 0  ;;  %s895_s15 = smov [#allocation6]   ;;  %s777_s19 = scalar_lea.hbm %s1069_s1, 256 }
   0x7   :  { %s38_s16 = sshll.u32 %s895_s15, 4  ;;  %p778_p0 = scmp.ne.s32.totalorder %s1069_s1, %s777_s19  ;;  %s39_s16 = int_to_ptr.vmem [resolvable:$true] %s38_s16 }
   0x8   :  { %p781_p1 = scmp.lt.u32.totalorder %s777_s19, %s1069_s1 }
   0xa   :  { %p783_p2 = pnand %p781_p1, %p778_p0 }
   0xc   :  { %786 = shalt.err (!%p783_p2)
}
   0xd   :  { %s787_s9 = scalar_lea.vmem %s39_s16, 256  ;;  %p792_p4 = scmp.lt.s32.totalorder %s39_s16, %s39_s16 }
   0xe   :  { %p788_p3 = scmp.ne.s32.totalorder %s39_s16, %s787_s9  ;;  %p793_p5 = scmp.lt.s32.totalorder %s787_s9, %s787_s9 }
  0x10   :  { %p794_p6 = por %p793_p5, %p792_p4 }
  0x12   :  { %p795_p7 = pnand %p794_p6, %p788_p3 }
  0x14   :  { %798 = shalt.err (!%p795_p7)
}
  0x15   :  { %s896_s24 = smov 128   ;;  %s897_s25 = smov 8  }
  0x16   :  { %44 = dma.hbm_to_vmem [thread:$0]  %s1069_s1, 256, %s39_s16, [#allocation7], %s896_s24, %s896_s24, %s897_s25  }
  0x17   :  { %s898_s28 = smov [#allocation3]   ;;  %s799_s12 = scalar_lea.hbm %s1068_s0, 768 }
  0x18   :  { %s26_s29 = sshll.u32 %s898_s28, 4  ;;  %p800_p8 = scmp.ne.s32.totalorder %s1068_s0, %s799_s12  ;;  %s27_s29 = int_to_ptr.vmem [resolvable:$true] %s26_s29 }
  0x19   :  { %p803_p9 = scmp.lt.u32.totalorder %s799_s12, %s1068_s0 }
  0x1b   :  { %p805_p10 = pnand %p803_p9, %p800_p8 }
  0x1d   :  { %808 = shalt.err (!%p805_p10)
}
  0x1e   :  { %s809_s18 = scalar_lea.vmem %s27_s29, 768  ;;  %p814_p12 = scmp.lt.s32.totalorder %s27_s29, %s27_s29 }
  0x1f   :  { %p810_p11 = scmp.ne.s32.totalorder %s27_s29, %s809_s18  ;;  %p815_p13 = scmp.lt.s32.totalorder %s809_s18, %s809_s18 }
  0x21   :  { %p816_p0 = por %p815_p13, %p814_p12 }
  0x23   :  { %p817_p1 = pnand %p816_p0, %p810_p11 }
  0x25   :  { %820 = shalt.err (!%p817_p1)
}
  0x26   :  { %s899_s1 = smov 384   ;;  %s900_s16 = smov 24  }
  0x27   :  { %32 = dma.hbm_to_vmem [thread:$0]  %s1068_s0, 768, %s27_s29, [#allocation4], %s899_s1, %s899_s1, %s900_s16  }
  0x28   :  { %s901_s21 = smov [#allocation8]   ;;  %s821_s26 = scalar_lea.hbm %s1070_s2, 3072 }
  0x29   :  { %s50_s22 = sshll.u32 %s901_s21, 4  ;;  %p822_p2 = scmp.ne.s32.totalorder %s1070_s2, %s821_s26  ;;  %s51_s22 = int_to_ptr.vmem [resolvable:$true] %s50_s22 }
  0x2a   :  { %p825_p3 = scmp.lt.u32.totalorder %s821_s26, %s1070_s2 }
  0x2c   :  { %p827_p4 = pnand %p825_p3, %p822_p2 }
  0x2e   :  { %830 = shalt.err (!%p827_p4)
}
  0x2f   :  { %s831_s12 = scalar_lea.vmem %s51_s22, 3072  ;;  %p836_p6 = scmp.lt.s32.totalorder %s51_s22, %s51_s22 }
  0x30   :  { %p832_p5 = scmp.ne.s32.totalorder %s51_s22, %s831_s12  ;;  %p837_p7 = scmp.lt.s32.totalorder %s831_s12, %s831_s12 }
  0x32   :  { %p838_p8 = por %p837_p7, %p836_p6 }
  0x34   :  { %p839_p9 = pnand %p838_p8, %p832_p5 }
  0x36   :  { %842 = shalt.err (!%p839_p9)
}
  0x37   :  { %s902_s0 = smov 64   ;;  %s903_s29 = smov 4  }
  0x38   :  { %56 = dma.hbm_to_vmem [thread:$0]  %s1070_s2, 3072, %s51_s22, [#allocation7], %s902_s0, %s902_s0, %s903_s29  }
  0x39   :  { %s904_s15 = smov [#allocation9]   ;;  %s843_s16 = scalar_lea.hbm %s1074_s6, 1024 }
  0x3a   :  { %s68_s17 = sshll.u32 %s904_s15, 4  ;;  %p844_p10 = scmp.ne.s32.totalorder %s1074_s6, %s843_s16  ;;  %s69_s17 = int_to_ptr.vmem [resolvable:$true] %s68_s17 }
  0x3b   :  { %p847_p11 = scmp.lt.u32.totalorder %s843_s16, %s1074_s6 }
  0x3d   :  { %p849_p12 = pnand %p847_p11, %p844_p10 }
  0x3f   :  { %852 = shalt.err (!%p849_p12)
}
  0x40   :  { %s853_s9 = scalar_lea.vmem %s69_s17, 1024  ;;  %p858_p0 = scmp.lt.s32.totalorder %s69_s17, %s69_s17 }
  0x41   :  { %p854_p13 = scmp.ne.s32.totalorder %s69_s17, %s853_s9  ;;  %p859_p1 = scmp.lt.s32.totalorder %s853_s9, %s853_s9 }
  0x43   :  { %p860_p2 = por %p859_p1, %p858_p0 }
  0x45   :  { %p861_p3 = pnand %p860_p2, %p854_p13 }
  0x47   :  { %864 = shalt.err (!%p861_p3)
}
  0x48   :  { %74 = dma.hbm_to_vmem [thread:$0]  %s1074_s6, 1024, %s69_s17, [#allocation10], %s902_s0, %s902_s0, %s903_s29  }
  0x49   :  { %887 = dma.done.wait [#allocation4], 768  }
  0x4a   :  { %888 = vsyncadd [#allocation4], 4294966528 }
  0x4b   :  { %889 = dma.done.wait [#allocation7], 3328  }
  0x4c   :  { %890 = vsyncadd [#allocation7], 4294963968 }
  0x4d   :  { %891 = dma.done.wait [#allocation10], 1024  }
  0x4e   :  { %892 = vsyncadd [#allocation10], 4294966272  ;;  %v905_v1 = vmov 0.0   ;;  %vm906_vm0 = vmmov 0   ;;  %v737_v2 = vld [vmem:[#allocation8 + $0x40] sm:$0xff]   ;;  %v740_v5 = vld [vmem:[#allocation8 + $0x48] sm:$0xff]   ;;  %v384_v50 = vlaneseq }
  0x4f   :  { %681 = vmatprep.subr.bf16.mxu1 %v905_v1  ;;  %697 = vmatprep.mubr.msk.bf16.mxu1 %vm906_vm0, %v905_v1  ;;  %v738_v3 = vld [vmem:[#allocation8] sm:$0xff]   ;;  %v741_v6 = vld [vmem:[#allocation8 + $0x8] sm:$0xff]   ;;  %v743_v8 = vld [vmem:[#allocation8 + $0x50] sm:$0xff]  }
  0x50   :  { %641 = vmatprep.subr.bf16.mxu0 %v737_v2  ;;  %v739_v4 = vld [vmem:[#allocation8 + $0x80] sm:$0xff]   ;;  %v742_v7 = vld [vmem:[#allocation8 + $0x88] sm:$0xff]   ;;  %v744_v9 = vld [vmem:[#allocation8 + $0x10] sm:$0xff]   ;;  %v385_v51 = vand.u32 127, %v384_v50 }
  0x51   :  { %642 = vmatpush3.bf16.msra.mxu0 %v738_v3  ;;  %682 = vmatpush3.bf16.msra.mxu1 %v739_v4  ;;  %v745_v10 = vld [vmem:[#allocation8 + $0x90] sm:$0xff]   ;;  %v746_v11 = vld [vmem:[#allocation8 + $0x58] sm:$0xff]   ;;  %v749_v14 = vld [vmem:[#allocation8 + $0x60] sm:$0xff]  }
  0x52   :  { %643 = vmatprep.subr.bf16.mxu0 %v740_v5  ;;  %683 = vmatprep.subr.bf16.mxu1 %v905_v1  ;;  %v747_v12 = vld [vmem:[#allocation8 + $0x18] sm:$0xff]   ;;  %v750_v15 = vld [vmem:[#allocation8 + $0x20] sm:$0xff]   ;;  %v752_v17 = vld [vmem:[#allocation8 + $0x68] sm:$0xff]   ;;  %vm386_vm1 = vcmp.lt.s32.totalorder %v385_v51, 50 }
  0x53   :  { %v748_v13 = vld [vmem:[#allocation8 + $0x98] sm:$0xff]   ;;  %v751_v16 = vld [vmem:[#allocation8 + $0xa0] sm:$0xff]   ;;  %v753_v18 = vld [vmem:[#allocation8 + $0x28] sm:$0xff]  }
  0x54   :  { %v754_v19 = vld [vmem:[#allocation8 + $0xa8] sm:$0xff]   ;;  %v755_v20 = vld [vmem:[#allocation8 + $0x70] sm:$0xff]   ;;  %v98_v23 = vld [vmem:[#allocation3 + $0x20] sm:$0xff] }
  0x55   :  { %644 = vmatpush3.bf16.msra.mxu0 %v741_v6  ;;  %684 = vmatpush3.bf16.msra.mxu1 %v742_v7  ;;  %v756_v21 = vld [vmem:[#allocation8 + $0x30] sm:$0xff]   ;;  %v95_v22 = vld [vmem:[#allocation3 + $0x8] sm:$0xff]  ;;  %v758_v25 = vld [vmem:[#allocation8 + $0x78] sm:$0xff]  }
  0x56   :  { %645 = vmatprep.subr.bf16.mxu0 %v743_v8  ;;  %685 = vmatprep.subr.bf16.mxu1 %v905_v1  ;;  %v757_v24 = vld [vmem:[#allocation8 + $0xb0] sm:$0xff]   ;;  %v101_v26 = vpack.c.bf16 %v98_v23, %v95_v22  ;;  %v759_v27 = vld [vmem:[#allocation8 + $0x38] sm:$0xff]   ;;  %v94_v28 = vld [vmem:[#allocation3] sm:$0xff] }
  0x57   :  { %v97_v29 = vld [vmem:[#allocation3 + $0x18] sm:$0xff]  ;;  %v96_v31 = vld [vmem:[#allocation3 + $0x10] sm:$0xff]  ;;  %v99_v32 = vld [vmem:[#allocation3 + $0x28] sm:$0xff] }
  0x58   :  { %334 = vmatprep.mubr.bf16.mxu0 %v101_v26  ;;  %v760_v30 = vld [vmem:[#allocation8 + $0xb8] sm:$0xff]   ;;  %v100_v33 = vpack.c.bf16 %v97_v29, %v94_v28  ;;  %v102_v34 = vpack.c.bf16 %v99_v32, %v96_v31  ;;  %v761_v62 = vld [vmem:[#allocation9] sm:$0xff]   ;;  %v762_v63 = vld [vmem:[#allocation9 + $0x8] sm:$0xff]  }
  0x59   :  { %646 = vmatpush3.bf16.msra.mxu0 %v744_v9  ;;  %686 = vmatpush3.bf16.msra.mxu1 %v745_v10  ;;  %v603_v37 = vld [vmem:[%s1071_s3] ss:$0 sm:$0xff]  ;;  %v763_v0 = vld [vmem:[#allocation9 + $0x10] sm:$0xff]   ;;  %v765_v3 = vld [vmem:[#allocation9 + $0x20] sm:$0xff]  }
  0x5a   :  { %647 = vmatprep.subr.bf16.mxu0 %v746_v11  ;;  %687 = vmatprep.subr.bf16.mxu1 %v905_v1  ;;  %v764_v2 = vld [vmem:[#allocation9 + $0x18] sm:$0xff]   ;;  %v766_v4 = vld [vmem:[#allocation9 + $0x28] sm:$0xff]   ;;  %v767_v5 = vld [vmem:[#allocation9 + $0x30] sm:$0xff]  }
  0x5b   :  { %v768_v6 = vld [vmem:[#allocation9 + $0x38] sm:$0xff]   ;;  %v431_v23 = vld [vmem:[#allocation6] sm:$0xff] }
  0x5c   :  { %v630_v29 = vld [vmem:[%s1075_s7] ss:$0 sm:$0xff]  ;;  %s908_s7 = smov [#allocation11]  }
  0x5d   :  { %648 = vmatpush3.bf16.msra.mxu0 %v747_v12  ;;  %688 = vmatpush3.bf16.msra.mxu1 %v748_v13 }
  0x5e   :  { %649 = vmatprep.subr.bf16.mxu0 %v749_v14  ;;  %689 = vmatprep.subr.bf16.mxu1 %v905_v1  ;;  %v628_v14 = vld [vmem:[%s1072_s4] ss:$0 sm:$0xff] }
  0x61   :  { %650 = vmatpush3.bf16.msra.mxu0 %v750_v15  ;;  %690 = vmatpush3.bf16.msra.mxu1 %v751_v16  ;;  %v629_v16 = vld [vmem:[%s1073_s5] ss:$0 sm:$0xff] }
  0x62   :  { %651 = vmatprep.subr.bf16.mxu0 %v752_v17  ;;  %691 = vmatprep.subr.bf16.mxu1 %v905_v1 }
  0x65   :  { %652 = vmatpush3.bf16.msra.mxu0 %v753_v18  ;;  %692 = vmatpush3.bf16.msra.mxu1 %v754_v19 }
  0x66   :  { %653 = vmatprep.subr.bf16.mxu0 %v755_v20  ;;  %693 = vmatprep.subr.bf16.mxu1 %v905_v1 }
  0x69   :  { %654 = vmatpush3.bf16.msra.mxu0 %v756_v21  ;;  %694 = vmatpush3.bf16.msra.mxu1 %v757_v24  ;;  %v432_v24 = vld [vmem:[#allocation6 + $0x8] sm:$0xff] }
  0x6a   :  { %655 = vmatprep.subr.bf16.mxu0 %v758_v25  ;;  %695 = vmatprep.subr.bf16.mxu1 %v905_v1 }
  0x6d   :  { %656 = vmatpush3.bf16.msra.mxu0 %v759_v27  ;;  %696 = vmatpush3.bf16.msra.mxu1 %v760_v30 }
  0x6e   :  { %701 = vmatprep.subr.bf16.mxu0 %v905_v1 }
  0x70   :  { %335 = vmatmul.mubr.bf16.vlgmr.msra.gmra.mrb[0].mxu0 %v100_v33  ;;  %698 = vmatmul.mubr.bf16.vlgmr.msra.gmra.mrb[0].mxu1 %v102_v34  ;;  %v639_v34 = vld [vmem:[%s1076_s8] ss:$0 sm:$0xff]  ;;  %s589_s8 = sshll.u32 %s908_s7, 4  ;;  %s590_s8 = int_to_ptr.vmem [resolvable:$true] %s589_s8 }
  0x71   :  { %717 = vmatprep.mubr.msk.bf16.mxu0 %vm906_vm0, %v905_v1  ;;  %702 = vmatpush3.bf16.msra.mxu0 %v761_v62  ;;  %s865_s0 = scalar_lea.vmem %s590_s8, 256  ;;  %p870_p5 = scmp.lt.s32.totalorder %s590_s8, %s590_s8 }
  0x72   :  { %703 = vmatprep.subr.bf16.mxu0 %v905_v1  ;;  %p866_p4 = scmp.ne.s32.totalorder %s590_s8, %s865_s0  ;;  %p871_p6 = scmp.lt.s32.totalorder %s865_s0, %s865_s0 }
  0x74   :  { %p872_p7 = por %p871_p6, %p870_p5 }
  0x75   :  { %704 = vmatpush3.bf16.msra.mxu0 %v762_v63 }
  0x76   :  { %705 = vmatprep.subr.bf16.mxu0 %v905_v1  ;;  %p873_p8 = pnand %p872_p7, %p866_p4 }
  0x79   :  { %706 = vmatpush3.bf16.msra.mxu0 %v763_v0 }
  0x7a   :  { %707 = vmatprep.subr.bf16.mxu0 %v905_v1 }
  0x7d   :  { %708 = vmatpush3.bf16.msra.mxu0 %v764_v2 }
  0x7e   :  { %709 = vmatprep.subr.bf16.mxu0 %v905_v1 }
  0x81   :  { %710 = vmatpush3.bf16.msra.mxu0 %v765_v3 }
  0x82   :  { %711 = vmatprep.subr.bf16.mxu0 %v905_v1 }
  0x85   :  { %712 = vmatpush3.bf16.msra.mxu0 %v766_v4 }
  0x86   :  { %713 = vmatprep.subr.bf16.mxu0 %v905_v1 }
  0x89   :  { %714 = vmatpush3.bf16.msra.mxu0 %v767_v5 }
  0x8a   :  { %715 = vmatprep.subr.bf16.mxu0 %v905_v1 }
  0x8d   :  { %716 = vmatpush3.bf16.msra.mxu0 %v768_v6 }
 0x143   :  { %v657_v35 = vpop.f32.mrb[0].mxu0  ;;  %v377_v38 = vpop.f32.mrb[0].mxu1 }
 0x144   :  { %v658_v36 = vpop.f32.mrb[1].mxu0  ;;  %v699_v41 = vpop.f32.mrb[1].mxu1 }
 0x145   :  { %v659_v39 = vadd.f32 %v658_v36, %v657_v35  ;;  %v660_v40 = vpop.f32.mrb[2].mxu0  ;;  %v380_v43 = vpop.f32.mrb[2].mxu1  ;;  %v907_v41 = vmov 0  }
 0x146   :  { %v661_v42 = vpop.f32.mrb[3].mxu0  ;;  %v700_v46 = vpop.f32.mrb[3].mxu1  ;;  %735 = vset.pattern.permute.xlu0 %v907_v41  ;;  %736 = vset.pattern.permute.xlu1 %v907_v41 }
 0x147   :  { %v337_v44 = vadd.f32 %v659_v39, %v603_v37  ;;  %v662_v45 = vadd.f32 %v661_v42, %v660_v40  ;;  %v640_v42 = vld [vmem:[#allocation2] ss:$0 sm:$0xff] }
 0x149   :  { %v378_v47 = vadd.f32 %v377_v38, %v337_v44  ;;  %v340_v48 = vadd.f32 %v662_v45, %v603_v37 }
 0x14b   :  { %v381_v49 = vadd.f32 %v380_v43, %v340_v48  ;;  %387 = vadd.xlane.f32.xlu0 %v378_v47 }
 0x14f   :  { %389 = vadd.xlane.f32.xlu0 %v381_v49 }
 0x1d8   :  { %v388_v52 = vpop.xlane.xlu0 %387 }
 0x1d9   :  { %v391_v53 = vmul.f32 0.02, %v388_v52 }
 0x1db   :  { %v393_v54 = vsub.f32 %v378_v47, %v391_v53 }
 0x1dc   :  { %v390_v55 = vpop.xlane.xlu0 %389 }
 0x1dd   :  { %v392_v56 = vmul.f32 0.02, %v390_v55  ;;  %v395_v57 = vsel %vm386_vm1, %v393_v54, 0.0 }
 0x1de   :  { %v397_v58 = vmul.f32 %v395_v57, %v395_v57 }
 0x1df   :  { %v394_v59 = vsub.f32 %v381_v49, %v392_v56 }
 0x1e0   :  { %399 = vadd.xlane.f32.xlu1 %v397_v58 }
 0x1e1   :  { %v396_v60 = vsel %vm386_vm1, %v394_v59, 0.0 }
 0x1e2   :  { %v398_v61 = vmul.f32 %v396_v60, %v396_v60 }
 0x1e4   :  { %401 = vadd.xlane.f32.xlu1 %v398_v61 }
 0x26d   :  { %v400_v7 = vpop.xlane.xlu1 %399 }
 0x26e   :  { %v403_v8 = vmul.f32 0.02, %v400_v7 }
 0x270   :  { %v405_v9 = vadd.f32 1e-05, %v403_v8 }
 0x271   :  { %v402_v10 = vpop.xlane.xlu1 %401 }
 0x272   :  { %769 = vrsqrt.f32 %v405_v9  ;;  %v404_v11 = vmul.f32 0.02, %v402_v10 }
 0x274   :  { %v406_v12 = vadd.f32 1e-05, %v404_v11 }
 0x276   :  { %771 = vrsqrt.f32 %v406_v12 }
 0x27c   :  { %v770_v13 = vpop.eup %769 }
 0x27d   :  { %v409_v15 = vmul.f32 %v770_v13, %v395_v57 }
 0x27f   :  { %v418_v1 = vmul.f32 %v628_v14, %v409_v15 }
 0x280   :  { %v772_v17 = vpop.eup %771 }
 0x281   :  { %v427_v18 = vadd.f32 %v629_v16, %v418_v1  ;;  %v410_v19 = vmul.f32 %v772_v17, %v396_v60 }
 0x283   :  { %v419_v20 = vmul.f32 %v628_v14, %v410_v19  ;;  %773 = vtanh.f32 %v427_v18 }
 0x285   :  { %v428_v21 = vadd.f32 %v629_v16, %v419_v20 }
 0x287   :  { %775 = vtanh.f32 %v428_v21 }
 0x28d   :  { %v774_v22 = vpop.eup %773 }
 0x28e   :  { %v433_v26 = vadd.f32 %v774_v22, %v431_v23 }
 0x291   :  { %v776_v25 = vpop.eup %775 }
 0x292   :  { %v434_v27 = vadd.f32 %v776_v25, %v432_v24 }
 0x294   :  { %v435_v28 = vpack.c.bf16 %v434_v27, %v433_v26 }
 0x296   :  { %718 = vmatmul.mubr.bf16.vlgmr.msra.gmra.mrb[4].mxu0 %v435_v28 }
 0x369   :  { %v541_v30 = vpop.f32.mrb[4].mxu0 }
 0x36a   :  { %v542_v31 = vadd.f32 %v630_v29, %v541_v30  ;;  %v719_v32 = vpop.f32.mrb[5].mxu0 }
 0x36b   :  { %v544_v33 = vpop.f32.mrb[6].mxu0 }
 0x36c   :  { %v548_v35 = vmax.f32 %v542_v31, 0.0  ;;  %v545_v36 = vadd.f32 %v630_v29, %v544_v33  ;;  %v720_v37 = vpop.f32.mrb[7].mxu0 }
 0x36e   :  { %v549_v38 = vmax.f32 %v545_v36, 0.0  ;;  %v557_v39 = vmul.f32 %v639_v34, %v548_v35 }
 0x370   :  { %559 = vadd.xlane.f32.xlu0 %v557_v39  ;;  %v558_v40 = vmul.f32 %v639_v34, %v549_v38 }
 0x372   :  { %561 = vadd.xlane.f32.xlu1 %v558_v40 }
 0x3fd   :  { %v560_v43 = vpop.xlane.xlu0 %559 }
 0x3fe   :  { %v570_v44 = vadd.f32 %v640_v42, %v560_v43 }
 0x3ff   :  { %v562_v45 = vpop.xlane.xlu1 %561 }
 0x400   :  { %v571_v46 = vadd.f32 %v640_v42, %v562_v45  ;;  %574 = vperm.xlu0 %735, %v570_v44  }
 0x402   :  { %579 = vperm.xlu1 %736, %v571_v46  }
 0x47f   :  { %v575_v47 = vpop.permute.xlu0 %574 }
 0x480   :  { %582 = vst [vmem:[#allocation11] sm:$0xff] %v575_v47 }
 0x481   :  { %v580_v48 = vpop.permute.xlu1 %579 }
 0x482   :  { %583 = vst [vmem:[#allocation11 + $0x8] sm:$0xff] %v580_v48 }
 0x483   :  { %876 = shalt.err (!%p873_p8)
}
 0x484   :  { %s877_s14 = scalar_lea.hbm %s1078_s10, 256 }
 0x485   :  { %p878_p9 = scmp.ne.s32.totalorder %s1078_s10, %s877_s14  ;;  %p881_p10 = scmp.lt.u32.totalorder %s877_s14, %s1078_s10 }
 0x487   :  { %p883_p11 = pnand %p881_p10, %p878_p9 }
 0x489   :  { %886 = shalt.err (!%p883_p11)
}
 0x48a   :  { %595 = dma.vmem_to_hbm [thread:$0]  %s590_s8, 256, %s1078_s10, [#allocation5], %s896_s24, %s896_s24, %s897_s25  }
 0x48b   :  { %893 = dma.done.wait [#allocation5], 256  }
 0x48c   :  { %894 = vsyncadd [#allocation5], 4294967040 }
 0x48d   :  { %599 = vsyncpa [#allocation4], 1 }
 0x48e   :  { %600 = vsyncpa [#allocation7], 1 }
 0x48f   :  { %601 = vsyncpa [#allocation10], 1 }
 0x490   :  { %602 = vsyncpa [#allocation5], 1 }

</bundles_post_ra>
